<compile_context>
chip_gen: v5e
topology: v5e:2x2
jax: 0.10.0
libtpu: 0.0.40
codegen_flags: <defaults>
</compile_context>

<pallas_src>
import jax
import jax.numpy as jnp
from jax.experimental import pallas as pl
from jax.experimental.pallas import tpu as pltpu

HIDDEN = 128       # hidden_size (scaled down from 4096 for the synthetic run)
NUM_EXPERTS = 8
TOP_K = 2


def _round_up(v, m):
    return ((v + m - 1) // m) * m


def moe_kernel(x_ref, w_f_ref, b_f_ref, w_co_ref, b_op_ref, o_ref):
    x = x_ref[...]                                                    # (TM, D_in)

    # One fused matmul: columns [0:E] are input_proj(x)[:, :E] (the only columns
    # reachable by the gather since idx < E <= H); columns [E:2E] are the router
    # logits via the fused weight (x @ W_in + b_in) @ W_r + b_r
    #                            == x @ (W_in @ W_r) + (b_in @ W_r + b_r).
    fused = jnp.dot(x, w_f_ref[...],
                    preferred_element_type=jnp.float32) + b_f_ref[...]  # (TM, 2E)
    two_e = fused.shape[-1]
    E = two_e // 2
    hidden_e = fused[:, :E]                                           # (TM, E)
    logits = fused[:, E:]                                             # (TM, E)

    tm = x.shape[0]
    expert_iota = jax.lax.broadcasted_iota(jnp.int32, (tm, E), 1)

    # Top-2 expert ids directly on logits (softmax is strictly monotone per row
    # and the weights are only used for ordering).  Lowest index wins exact
    # ties, matching lax.top_k.
    m1 = jnp.max(logits, axis=-1, keepdims=True)
    idx1 = jnp.min(jnp.where(logits == m1, expert_iota, E),
                   axis=-1, keepdims=True)                            # (TM, 1)
    l2 = jnp.where(expert_iota == idx1, -jnp.inf, logits)
    m2 = jnp.max(l2, axis=-1, keepdims=True)
    idx2 = jnp.min(jnp.where(l2 == m2, expert_iota, E),
                   axis=-1, keepdims=True)                            # (TM, 1)

    # Merged masked gather: gather(hidden, -1, idx) with a constant index along
    # the last dim is the per-token scalar hidden[:, idx]; idx1 != idx2, so one
    # masked reduction over (TM, E) yields hidden[:, idx1] + hidden[:, idx2].
    sel = (expert_iota == idx1) | (expert_iota == idx2)
    agg_scalar = jnp.sum(jnp.where(sel, hidden_e, 0.0),
                         axis=-1, keepdims=True) * (1.0 / TOP_K)      # (TM, 1)

    # output_proj on the scalar-broadcast agg:
    #   agg @ W_out + b_out == agg_scalar * colsum(W_out) + b_out
    o_ref[...] = (agg_scalar * w_co_ref[...] + b_op_ref[...]).astype(o_ref.dtype)


def prepare_moe_params(params):
    """One-time algebraic weight preparation (exact; FP summation order only)."""
    w_in, b_in, w_r, b_r, w_out, b_out = params
    E = w_r.shape[1]
    assert E <= w_in.shape[1]
    w_he = w_in[:, :E]                                   # (D_in, E) values path
    b_he = b_in[:, :E]                                   # (1, E)
    w_fr = w_in @ w_r                                    # (D_in, E) fused router weight
    b_fr = b_in @ w_r + b_r                              # (1, E)
    w_fused = jnp.concatenate([w_he, w_fr], axis=1)      # (D_in, 2E)
    b_fused = jnp.concatenate([b_he, b_fr], axis=1)      # (1, 2E)
    w_co = jnp.sum(w_out, axis=0, keepdims=True)         # (1, D_out) colsum(W_out)
    return w_fused, b_fused, w_co, b_out


def moe_forward(x, fused_params, tm=2048):
    """x: (B, S, D_in) float32 -> (B, S, D_out) float32."""
    w_fused, b_fused, w_co, b_out = fused_params
    B, S, D_in = x.shape
    two_e = w_fused.shape[1]
    D_out = w_co.shape[1]

    N = B * S
    x2 = x.reshape(N, D_in)

    # Row tile: big for large N (amortizes ~0.35 us/step pipeline overhead),
    # shrunk for small N so the "parallel" grid axis still has >= 2 steps and
    # both v7x TensorCores get work.  Partial last block is masked by Pallas,
    # so no wrapper-side padding / slicing (no extra HBM round trips).
    tm_eff = max(8, min(_round_up(tm, 8), _round_up(N, 8)))
    if N >= 16 and -(-N // tm_eff) < 2:
        tm_eff = max(8, _round_up(-(-N // 2), 8))
    grid = (pl.cdiv(N, tm_eff),)

    cost = pl.CostEstimate(
        flops=2 * N * D_in * two_e + 10 * N * two_e + 2 * N * D_out,
        transcendentals=0,
        bytes_accessed=4 * (N * D_in + D_in * two_e + two_e
                            + 2 * D_out + N * D_out),
    )

    out = pl.pallas_call(
        moe_kernel,
        out_shape=jax.ShapeDtypeStruct((N, D_out), jnp.float32),
        grid_spec=pltpu.PrefetchScalarGridSpec(
            num_scalar_prefetch=0,
            grid=grid,
            in_specs=[
                pl.BlockSpec((tm_eff, D_in), lambda i: (i, 0)),   # x tile
                pl.BlockSpec((D_in, two_e), lambda i: (0, 0)),    # [W_in[:, :E] | W_in@W_r]
                pl.BlockSpec((1, two_e), lambda i: (0, 0)),       # fused biases
                pl.BlockSpec((1, D_out), lambda i: (0, 0)),       # colsum(W_out)
                pl.BlockSpec((1, D_out), lambda i: (0, 0)),       # b_out
            ],
            out_specs=pl.BlockSpec((tm_eff, D_out), lambda i: (i, 0)),
        ),
        compiler_params=pltpu.CompilerParams(
            dimension_semantics=("parallel",),
            vmem_limit_bytes=32 * 1024 * 1024),
        cost_estimate=cost,
    )(x2, w_fused, b_fused, w_co, b_out)

    return out.reshape(B, S, D_out)


def moe_reference(x, params):
    """Pure-JAX reference mirroring the PyTorch forward (backbone = identity)."""
    w_in, b_in, w_r, b_r, w_out, b_out = params
    hidden = x @ w_in + b_in[0]
    logits = hidden @ w_r + b_r[0]
    weights = jax.nn.softmax(logits, axis=-1)
    _, idx = jax.lax.top_k(weights, TOP_K)
    agg = jnp.zeros_like(hidden)
    for k in range(TOP_K):
        val = jnp.take_along_axis(hidden, idx[..., k:k + 1], axis=-1)
        agg = agg + jnp.broadcast_to(val, hidden.shape) / TOP_K
    return agg @ w_out + b_out[0]


if __name__ == "__main__":
    key = jax.random.PRNGKey(0)
    B, S, D_in, D_out = 2, 8, 32, 32
    ks = jax.random.split(key, 7)
    scale = 0.05
    x = jax.random.normal(ks[0], (B, S, D_in), jnp.float32)
    w_in = jax.random.normal(ks[1], (D_in, HIDDEN), jnp.float32) * scale
    b_in = jax.random.normal(ks[2], (1, HIDDEN), jnp.float32) * scale
    w_r = jax.random.normal(ks[3], (HIDDEN, NUM_EXPERTS), jnp.float32) * scale
    b_r = jax.random.normal(ks[4], (1, NUM_EXPERTS), jnp.float32) * scale
    w_out = jax.random.normal(ks[5], (HIDDEN, D_out), jnp.float32) * scale
    b_out = jax.random.normal(ks[6], (1, D_out), jnp.float32) * scale
    params = (w_in, b_in, w_r, b_r, w_out, b_out)

    # Prepared once per parameter set (not per forward call).
    fused_params = jax.tree_util.tree_map(jax.block_until_ready,
                                          prepare_moe_params(params))

    out = moe_forward(x, fused_params)
    out = jax.block_until_ready(out)

    ref = moe_reference(x, params)
    assert out.shape == (B, S, D_out)
    assert jnp.allclose(out, ref, atol=1e-4, rtol=1e-4), "Pallas/ref mismatch"
    print("KERNEL_OK")
</pallas_src>

<mosaic_0001>
module attributes {stable_mosaic.version = 11 : i64} {
  func.func @moe_kernel(%arg0: i32, %arg1: memref<8x32xf32, #tpu.memory_space<vmem>>, %arg2: memref<32x16xf32, #tpu.memory_space<vmem>>, %arg3: memref<1x16xf32, #tpu.memory_space<vmem>>, %arg4: memref<1x32xf32, #tpu.memory_space<vmem>>, %arg5: memref<1x32xf32, #tpu.memory_space<vmem>>, %arg6: memref<8x32xf32, #tpu.memory_space<vmem>>) attributes {dimension_semantics = [#tpu.dimension_semantics<parallel>], iteration_bounds = array<i64: 2>, scalar_prefetch = 0 : i64, scratch_operands = 0 : i64, tpu.core_type = #tpu.core_type<tc>, window_params = [{transform_indices = @transform_0, window_bounds = array<i64: 8, 32>}, {pipeline_mode = #tpu.pipeline_mode<synchronous>, transform_indices = @transform_1, window_bounds = array<i64: 32, 16>}, {pipeline_mode = #tpu.pipeline_mode<synchronous>, transform_indices = @transform_2, window_bounds = array<i64: 1, 16>}, {pipeline_mode = #tpu.pipeline_mode<synchronous>, transform_indices = @transform_3, window_bounds = array<i64: 1, 32>}, {pipeline_mode = #tpu.pipeline_mode<synchronous>, transform_indices = @transform_4, window_bounds = array<i64: 1, 32>}, {transform_indices = @transform_5, window_bounds = array<i64: 8, 32>}]} {
    %c0 = arith.constant 0 : index
    %c0_0 = arith.constant 0 : index
    %0 = vector.load %arg1[%c0, %c0_0] : memref<8x32xf32, #tpu.memory_space<vmem>>, vector<8x32xf32>
    %c0_1 = arith.constant 0 : index
    %c0_2 = arith.constant 0 : index
    %1 = vector.load %arg2[%c0_1, %c0_2] : memref<32x16xf32, #tpu.memory_space<vmem>>, vector<32x16xf32>
    %cst = arith.constant dense<0.000000e+00> : vector<8x16xf32>
    %2 = tpu.matmul %0, %1, %cst {dimension_numbers = #tpu.dot_dimension_numbers<[1], [0], [0], [1], [0, 0, 1, 1], [], []>} : vector<8x32xf32>, vector<32x16xf32>, vector<8x16xf32> -> vector<8x16xf32>
    %c0_3 = arith.constant 0 : index
    %c0_4 = arith.constant 0 : index
    %3 = vector.load %arg3[%c0_3, %c0_4] : memref<1x16xf32, #tpu.memory_space<vmem>>, vector<1x16xf32>
    %4 = vector.broadcast %3 : vector<1x16xf32> to vector<8x16xf32>
    %5 = arith.addf %2, %4 : vector<8x16xf32>
    %6 = vector.extract_strided_slice %5 {offsets = [0, 0], sizes = [8, 8], strides = [1, 1]} : vector<8x16xf32> to vector<8x8xf32>
    %7 = vector.extract_strided_slice %5 {offsets = [0, 8], sizes = [8, 8], strides = [1, 1]} : vector<8x16xf32> to vector<8x8xf32>
    %8 = tpu.iota {dimensions = array<i32: 1>} : vector<8x8xi32>
    %cst_5 = arith.constant dense<0xFF800000> : vector<8xf32>
    %9 = vector.multi_reduction <maximumf>, %7, %cst_5 [1] : vector<8x8xf32> to vector<8xf32>
    %10 = vector.shape_cast %9 : vector<8xf32> to vector<8x1xf32>
    %11 = vector.broadcast %10 : vector<8x1xf32> to vector<8x8xf32>
    %12 = arith.cmpf oeq, %7, %11 : vector<8x8xf32>
    %c8_i32 = arith.constant 8 : i32
    %13 = vector.broadcast %c8_i32 : i32 to vector<8x8xi32>
    %14 = arith.select %12, %8, %13 : vector<8x8xi1>, vector<8x8xi32>
    %cst_6 = arith.constant dense<2147483647> : vector<8xi32>
    %15 = vector.multi_reduction <minsi>, %14, %cst_6 [1] : vector<8x8xi32> to vector<8xi32>
    %16 = vector.shape_cast %15 : vector<8xi32> to vector<8x1xi32>
    %17 = vector.broadcast %16 : vector<8x1xi32> to vector<8x8xi32>
    %18 = arith.cmpi eq, %8, %17 : vector<8x8xi32>
    %cst_7 = arith.constant 0xFF800000 : f32
    %19 = vector.broadcast %cst_7 : f32 to vector<8x8xf32>
    %20 = arith.select %18, %19, %7 : vector<8x8xi1>, vector<8x8xf32>
    %cst_8 = arith.constant dense<0xFF800000> : vector<8xf32>
    %21 = vector.multi_reduction <maximumf>, %20, %cst_8 [1] : vector<8x8xf32> to vector<8xf32>
    %22 = vector.shape_cast %21 : vector<8xf32> to vector<8x1xf32>
    %23 = vector.broadcast %22 : vector<8x1xf32> to vector<8x8xf32>
    %24 = arith.cmpf oeq, %20, %23 : vector<8x8xf32>
    %c8_i32_9 = arith.constant 8 : i32
    %25 = vector.broadcast %c8_i32_9 : i32 to vector<8x8xi32>
    %26 = arith.select %24, %8, %25 : vector<8x8xi1>, vector<8x8xi32>
    %cst_10 = arith.constant dense<2147483647> : vector<8xi32>
    %27 = vector.multi_reduction <minsi>, %26, %cst_10 [1] : vector<8x8xi32> to vector<8xi32>
    %28 = vector.shape_cast %27 : vector<8xi32> to vector<8x1xi32>
    %29 = vector.broadcast %16 : vector<8x1xi32> to vector<8x8xi32>
    %30 = arith.cmpi eq, %8, %29 : vector<8x8xi32>
    %31 = vector.broadcast %28 : vector<8x1xi32> to vector<8x8xi32>
    %32 = arith.cmpi eq, %8, %31 : vector<8x8xi32>
    %33 = arith.ori %30, %32 : vector<8x8xi1>
    %cst_11 = arith.constant 0.000000e+00 : f32
    %34 = vector.broadcast %cst_11 : f32 to vector<8x8xf32>
    %35 = arith.select %33, %6, %34 : vector<8x8xi1>, vector<8x8xf32>
    %cst_12 = arith.constant dense<0.000000e+00> : vector<8xf32>
    %36 = vector.multi_reduction <add>, %35, %cst_12 [1] : vector<8x8xf32> to vector<8xf32>
    %37 = vector.shape_cast %36 : vector<8xf32> to vector<8x1xf32>
    %cst_13 = arith.constant 5.000000e-01 : f32
    %38 = vector.broadcast %cst_13 : f32 to vector<8x1xf32>
    %39 = arith.mulf %37, %38 : vector<8x1xf32>
    %c0_14 = arith.constant 0 : index
    %c0_15 = arith.constant 0 : index
    %40 = vector.load %arg4[%c0_14, %c0_15] : memref<1x32xf32, #tpu.memory_space<vmem>>, vector<1x32xf32>
    %41 = vector.broadcast %39 : vector<8x1xf32> to vector<8x32xf32>
    %42 = vector.broadcast %40 : vector<1x32xf32> to vector<8x32xf32>
    %43 = arith.mulf %41, %42 : vector<8x32xf32>
    %c0_16 = arith.constant 0 : index
    %c0_17 = arith.constant 0 : index
    %44 = vector.load %arg5[%c0_16, %c0_17] : memref<1x32xf32, #tpu.memory_space<vmem>>, vector<1x32xf32>
    %45 = vector.broadcast %44 : vector<1x32xf32> to vector<8x32xf32>
    %46 = arith.addf %43, %45 : vector<8x32xf32>
    %c0_18 = arith.constant 0 : index
    %c0_19 = arith.constant 0 : index
    %47 = vector.load %arg6[%c0_18, %c0_19] : memref<8x32xf32, #tpu.memory_space<vmem>>, vector<8x32xf32>
    tpu.vector_store %arg6[%c0_18, %c0_19], %46 {strides = array<i32>} : memref<8x32xf32, #tpu.memory_space<vmem>>, vector<8x32xf32>,
    return
  }
  func.func @transform_0(%arg0: i32) -> (i32, i32) {
    %c0_i32 = arith.constant 0 : i32
    %c0_i32_0 = arith.constant 0 : i32
    return %arg0, %c0_i32 : i32, i32
  }
  func.func @transform_1(%arg0: i32) -> (i32, i32) {
    %c0_i32 = arith.constant 0 : i32
    %c0_i32_0 = arith.constant 0 : i32
    %c0_i32_1 = arith.constant 0 : i32
    return %c0_i32, %c0_i32_0 : i32, i32
  }
  func.func @transform_2(%arg0: i32) -> (i32, i32) {
    %c0_i32 = arith.constant 0 : i32
    %c0_i32_0 = arith.constant 0 : i32
    %c0_i32_1 = arith.constant 0 : i32
    return %c0_i32, %c0_i32_0 : i32, i32
  }
  func.func @transform_3(%arg0: i32) -> (i32, i32) {
    %c0_i32 = arith.constant 0 : i32
    %c0_i32_0 = arith.constant 0 : i32
    %c0_i32_1 = arith.constant 0 : i32
    return %c0_i32, %c0_i32_0 : i32, i32
  }
  func.func @transform_4(%arg0: i32) -> (i32, i32) {
    %c0_i32 = arith.constant 0 : i32
    %c0_i32_0 = arith.constant 0 : i32
    %c0_i32_1 = arith.constant 0 : i32
    return %c0_i32, %c0_i32_0 : i32, i32
  }
  func.func @transform_5(%arg0: i32) -> (i32, i32) {
    %c0_i32 = arith.constant 0 : i32
    %c0_i32_0 = arith.constant 0 : i32
    return %arg0, %c0_i32 : i32, i32
  }
}

</mosaic_0001>

<bundles_post_ra>
// kernel: tpu_custom_call.1
= control target key start
LH: loop header
LB: loop body
LE: loop exit
PB: predicated region body
PF: predicated region fallthrough
CT: control target
= control target key end

     0   :  { %10 = vsyncpa [#allocation3], 0  ;;  %s662_s0 = inlined_call_operand.vmem [shape: f32[16,32], index: 0, kind: input, shape index: {}]   ;;  %s663_s1 = inlined_call_operand.vmem [shape: f32[32,16], index: 1, kind: input, shape index: {}]   ;;  %s664_s2 = inlined_call_operand.vmem [shape: f32[1,16], index: 2, kind: input, shape index: {}]   ;;  %s665_s3 = inlined_call_operand.vmem [shape: f32[1,32], index: 3, kind: input, shape index: {}]   ;;  %s666_s4 = inlined_call_operand.vmem [shape: f32[1,32], index: 4, kind: input, shape index: {}]   ;;  %s667_s5 = inlined_call_operand.hbm [shape: f32[16,32], index: 5, kind: output, shape index: {}]  }
   0x1   :  { %12 = vsyncpa [#allocation3 + $0x1], 0  ;;  %s549_s18 = smov 0   ;;  %s551_s19 = smov 0  }
   0x2   :  { %s553_s20 = smov 0   ;;  %s555_s21 = smov 0  }
   0x3 LB: > { %s570_s22 = sadd.s32 4294967295, %s515_s21   ;;  %s398_s23 = sadd.s32 4294967294, %s515_s21   ;;  %s515_s21 = sphi %s555_s21, %s673_s21   ;;  %s511_s20 = sphi %s553_s20, %s672_s20   ;;  %s507_s19 = sphi %s551_s19, %s671_s19   ;;  %s503_s18 = sphi %s549_s18, %s670_s18  }
   0x4   : > { %s574_s24 = sadd.s32 1, %s515_s21   ;;  %s135_s25 = sadd.s32 1, %s511_s20 }
   0x5   : > { %s132_s26 = ssub.s32 %s515_s21, %s574_s24  ;;  %p145_p0 = scmp.ne.s32.totalorder %s511_s20, %s507_s19 }
   0x6   : > { %p133_p1 = scmp.eq.s32.totalorder %s132_s26, 0  ;;  %p146_p2 = scmp.eq.s32.totalorder %s570_s22, 1 }
   0x7   : > { %p151_p3 = scmp.ne.s32.totalorder %s507_s19, %s503_s18  ;;  %p152_p4 = scmp.eq.s32.totalorder %s398_s23, 1 }
   0x8   : > { %s585_s27 = scalar_select %p133_p1, %s511_s20, %s135_s25  }
   0x9   : > { %p587_p5 = por %p146_p2, %p145_p0  ;;  %p591_p6 = por %p152_p4, %p151_p3 }
   0xa   : > { %p401_p7 = scmp.ge.s32.totalorder %s515_s21, 1  ;;  %p189_p8 = scmp.lt.s32.totalorder %s515_s21, 3 }
   0xc   : > { %p190_p9 = pnand %p401_p7, %p189_p8 }
   0xd   : > { %p216_p10 = scmp.lt.s32.totalorder (!%p190_p9), %s570_s22, 1  ;;  %s517_s26 = smov (!%p190_p9), 120  }
   0xe   : > { %193 = sbr.rel (%p190_p9) target bundleno = 1028 (0x404), region = 40  ;;  %s518_s30 = smov (!%p190_p9), 8  }
   0xf   : > { %s213_s6 = sand.u32 (!%p190_p9), 1, %s507_s19   ;;  %s406_s8 = sshll.u32 (!%p190_p9), %s570_s22, 3 }
  0x10   : > { %s402_s7 = sshll.u32 (!%p190_p9), %s213_s6, 3  ;;  %s334_s13 = scalar_lea.hbm (!%p190_p9), %s667_s5, %s406_s8 }
  0x11   : > { %s215_s16 = scalar_lea.vmem (!%p190_p9), [#allocation2], %s402_s7  ;;  %s338_s23 = sshll.u32 (!%p190_p9), %s334_s13, 4  ;;  %s339_s23 = int_to_ptr.hbm [resolvable:$true] %s338_s23 }
  0x12   : > { %s467_s25 = sshra.s32 (!%p190_p9), %s339_s23, 4  ;;  %s473_s7 = scalar_lea.hbm (!%p190_p9), %s667_s5, 16  ;;  %s468_s25 = int_to_ptr.hbm [resolvable:$true] %s467_s25 }
  0x13   : > { %v224_v0 = vld [vmem:[%s663_s1 + $0x18] sm:$0xff]  ;;  %v223_v1 = vld [vmem:[%s663_s1 + $0x10] sm:$0xff]  ;;  %v222_v2 = vld [vmem:[%s663_s1 + $0x8] sm:$0xff]  ;;  %s217_s11 = scalar_select %p216_p10, %s570_s22, 1  ;;  %vm229_vm0 = vcmask 261120   ;;  %vm255_vm1 = vcmask 130112   ;;  %v253_v9 = vlaneseq }
  0x14   : > { %245 = vmatpush.msra.mxu0 %v224_v0  ;;  %v221_v3 = vld [vmem:[%s663_s1] sm:$0xff]  ;;  %vm284_vm4 = vcmask 64512   ;;  %s324_s22 = scalar_lea.sflag [#allocation3], %s213_s6  ;;  %p474_p0 = scmp.lt.s32.totalorder %s468_s25, %s667_s5 }
  0x15   : > { %s403_s14 = sshll.u32 %s217_s11, 3  ;;  %v450_v5 = vld [vmem:[%s664_s2] ss:$0 sm:$0xff]  ;;  %v254_v10 = vand.u32 127, %v253_v9 }
  0x16   : > { %246 = vmatpush.msra.mxu0 %v223_v1  ;;  %s219_s17 = scalar_lea.vmem %s662_s0, %s403_s14  ;;  %v451_v45 = vld [vmem:[%s665_s3] ss:$0 sm:$0xff] }
  0x17   : > { %v220_v4 = vld [vmem:[%s219_s17] sm:$0xff]  ;;  %s336_s17 = sshll.u32 %s215_s16, 4  ;;  %s337_s17 = int_to_ptr.vmem [resolvable:$true] %s336_s17 }
  0x18   : > { %247 = vmatpush.msra.mxu0 %v222_v2  ;;  %v452_v47 = vld [vmem:[%s666_s4] ss:$0 sm:$0xff] }
  0x1a   : > { %248 = vmatpush.msra.mxu0 %v221_v3 }
  0x1b   : > { %404 = vmatmul.msk.f32.vlgmr.msra.gmra.mxu0 %vm229_vm0, %v220_v4 }
  0x98   : > { %v250_v6 = vpop.f32.mrf.mxu0 }
  0x99   : > { %v251_v7 = vadd.f32 %v450_v5, %v250_v6 }
  0x9b   : > { %280 = vrot.lane.b32.xlu2 %v251_v7, %s517_s26  ;;  %v256_v8 = vsel %vm255_vm1, %v251_v7, -inf  ;;  %s469_s26 = scalar_lea.hbm %s468_s25, 8 }
  0x9c   : > { %257 = vmax.xlane.f32.xlu0 %v256_v8  ;;  %p470_p11 = scmp.ne.s32.totalorder %s468_s25, %s469_s26  ;;  %p475_p1 = scmp.lt.s32.totalorder %s473_s7, %s469_s26 }
  0x9e   : > { %p471_p12 = pnand %p470_p11, %p587_p5  ;;  %p476_p2 = por %p475_p1, %p474_p0 }
  0xa0   : > { %p472_p13 = pneg %p471_p12 }
  0xa2   : > { %p477_p3 = pnand %p476_p2, %p472_p13 }
  0xb0   : > { %260 = vrot.lane.b32.xlu0 %v254_v10, %s518_s30 }
  0xf5   : > { %v281_v26 = vpop.permute.xlu2 %280 }
 0x10f   : > { %v258_v11 = vpop.xlane.xlu0 %257 }
 0x110   : > { %vm259_vm2 = vcmp.eq.f32.partialorder %v251_v7, %v258_v11 }
 0x122   : > { %v261_v12 = vpop.permute.xlu0 %260 }
 0x123   : > { %v262_v13 = vsel %vm259_vm2, %v261_v12, 8 }
 0x124   : > { %v263_v14 = vsel %vm255_vm1, %v262_v13, 2147483647 }
 0x125   : > { %v265_v15 = vshra.s32 %v263_v14, 16  ;;  %v264_v17 = vand.u32 65535, %v263_v14 }
 0x127   : > { %v267_v16 = vcvt.s32.f32 %v265_v15  ;;  %v266_v19 = vcvt.s32.f32 %v264_v17 }
 0x129   : > { %268 = vmin.xlane.f32.xlu1 %v267_v16 }
 0x19c   : > { %v269_v18 = vpop.xlane.xlu1 %268 }
 0x19d   : > { %vm270_vm3 = vcmp.eq.f32.partialorder %v267_v16, %v269_v18  ;;  %v275_v21 = vcvt.f32.s32 %v269_v18 }
 0x19e   : > { %v271_v20 = vsel %vm270_vm3, %v266_v19, inf }
 0x19f   : > { %272 = vmin.xlane.f32.xlu1 %v271_v20  ;;  %v276_v23 = vshll.u32 %v275_v21, 16 }
 0x212   : > { %v273_v22 = vpop.xlane.xlu1 %272 }
 0x213   : > { %v274_v24 = vcvt.f32.s32 %v273_v22 }
 0x215   : > { %v277_v25 = vadd.s32 %v276_v23, %v274_v24 }
 0x217   : > { %vm278_vm5 = vcmp.eq.s32.totalorder %v254_v10, %v277_v25 }
 0x218   : > { %v283_v27 = vsel %vm278_vm5, -inf, %v281_v26 }
 0x219   : > { %v285_v28 = vsel %vm284_vm4, %v283_v27, -inf }
 0x21a   : > { %286 = vmax.xlane.f32.xlu2 %v285_v28 }
 0x28d   : > { %v287_v29 = vpop.xlane.xlu2 %286 }
 0x28e   : > { %vm288_vm6 = vcmp.eq.f32.partialorder %v283_v27, %v287_v29 }
 0x28f   : > { %v289_v30 = vsel %vm288_vm6, %v254_v10, 8 }
 0x290   : > { %v290_v31 = vsel %vm284_vm4, %v289_v30, 2147483647 }
 0x291   : > { %v292_v32 = vshra.s32 %v290_v31, 16  ;;  %v291_v34 = vand.u32 65535, %v290_v31 }
 0x293   : > { %v294_v33 = vcvt.s32.f32 %v292_v32  ;;  %v293_v36 = vcvt.s32.f32 %v291_v34 }
 0x295   : > { %295 = vmin.xlane.f32.xlu1 %v294_v33 }
 0x308   : > { %v296_v35 = vpop.xlane.xlu1 %295 }
 0x309   : > { %vm297_vm7 = vcmp.eq.f32.partialorder %v294_v33, %v296_v35  ;;  %v302_v38 = vcvt.f32.s32 %v296_v35 }
 0x30a   : > { %v298_v37 = vsel %vm297_vm7, %v293_v36, inf }
 0x30b   : > { %299 = vmin.xlane.f32.xlu1 %v298_v37  ;;  %v303_v40 = vshll.u32 %v302_v38, 16 }
 0x37e   : > { %v300_v39 = vpop.xlane.xlu1 %299 }
 0x37f   : > { %v301_v41 = vcvt.f32.s32 %v300_v39 }
 0x381   : > { %v304_v42 = vadd.s32 %v303_v40, %v301_v41 }
 0x383   : > { %vm305_vm8 = vcmp.eq.s32.totalorder %v254_v10, %v304_v42 }
 0x384   : > { %vm306_vm9 = vmor %vm278_vm5, %vm305_vm8 }
 0x385   : > { %v307_v43 = vsel %vm306_vm9, %v251_v7, 0.0 }
 0x386   : > { %v308_v44 = vsel %vm284_vm4, %v307_v43, 0.0 }
 0x387   : > { %309 = vadd.xlane.f32.xlu0 %v308_v44 }
 0x3fa   : > { %v310_v46 = vpop.xlane.xlu0 %309 }
 0x3fb   : > { %v311_v48 = vmul.f32 0.5, %v310_v46 }
 0x3fd   : > { %v316_v49 = vmul.f32 %v451_v45, %v311_v48 }
 0x3ff   : > { %v321_v50 = vadd.f32 %v452_v47, %v316_v49 }
 0x401   : > { %322 = vst.msk [vmem:[%s215_s16] sm:$0xff] %vm229_vm0, %v321_v50 }
 0x402   : > { %480 = shalt.err (!%p477_p3)
}
 0x403   : > { %409 = dma.vmem_to_hbm [thread:$0]  (%p587_p5), %s337_s17, 128, %s339_s23, %s324_s22  }
 0x404 PF: > { %p415_p4 = scmp.ge.s32.totalorder %s515_s21, 2  ;;  %s350_s6 = sand.u32 1, %s503_s18  }
 0x405   : > { %s351_s11 = scalar_lea.sflag [#allocation3], %s350_s6 }
 0x406   : > { %p412_p7 = pnand %p415_p4, %p591_p6 }
 0x408   : > { %p413_p8 = pneg %p412_p7 }
 0x40a   : > { %498 = dma.done.wait (%p413_p8), %s351_s11, 128  }
 0x40b   : > { %500 = vsyncadd (%p413_p8), %s351_s11, 4294967168  ;;  %p15_p9 = scmp.ge.s32.totalorder %s574_s24, 4   ;;  %s670_s18 = smov %s507_s19 }
 0x40c   : > { %s671_s19 = smov %s511_s20  ;;  %s672_s20 = smov %s585_s27 }
 0x40d   : > { %s673_s21 = smov %s574_s24  ;;  %17 = sbr.rel (!%p15_p9) target bundleno = 3 (0x3), region = 75 }
 0x412   :  { %357 = vsyncpa [#allocation3], 1 }
 0x413   :  { %359 = vsyncpa [#allocation3 + $0x1], 1 }

</bundles_post_ra>
